<compile_context>
chip_gen: v5e
topology: v5e:2x2
jax: 0.10.0
libtpu: 0.0.40
codegen_flags: <defaults>
</compile_context>

<pallas_src>
import jax
import jax.numpy as jnp
from jax.experimental import pallas as pl
from jax.experimental.pallas import tpu as pltpu

_MIB = 1024 * 1024


def _round_up(x, m):
    return ((x + m - 1) // m) * m


def qwen_mlp_kernel(x_ref, wg_ref, wu_ref, wc_ref, o_ref, acc_ref):
    """One (seq-tile, inter-tile) step of the fused MLP.

    x_ref  : [tm, H]   activation tile (native dtype, e.g. bf16)
    wg_ref : [H, ti]   gate-projection weight tile
    wu_ref : [H, ti]   up-projection weight tile
    wc_ref : [ti, H]   c_proj weight tile
    o_ref  : [tm, H]   output tile (written at last inter step)
    acc_ref: [tm, H]   fp32 accumulator scratch
    """
    j = pl.program_id(1)

    @pl.when(j == 0)
    def _init():
        acc_ref[...] = jnp.zeros_like(acc_ref)

    x = x_ref[...]  # keep native dtype for the MXU

    # Gate / up projections for this intermediate tile (fp32 accumulation).
    gate = jnp.dot(x, wg_ref[...], preferred_element_type=jnp.float32)  # [tm, ti]
    up = jnp.dot(x, wu_ref[...], preferred_element_type=jnp.float32)    # [tm, ti]

    # SiluAndMul in fp32 (VPU/EUP); cast back to weight dtype for the MXU.
    act = (gate * jax.nn.sigmoid(gate) * up).astype(wc_ref.dtype)        # [tm, ti]

    # Partial c_proj contribution of this intermediate tile.
    acc_ref[...] += jnp.dot(act, wc_ref[...], preferred_element_type=jnp.float32)

    @pl.when(j == pl.num_programs(1) - 1)
    def _finalize():
        o_ref[...] = acc_ref[...].astype(o_ref.dtype)


def _vmem_capacity_bytes():
    try:
        return int(pltpu.get_tpu_info().vmem_capacity_bytes)
    except Exception:
        return 64 * _MIB  # conservative fallback (fits every generation)


def _vmem_need_bytes(tm, ti, H, itemsize):
    """Working-set estimate for the pipelined blocks + scratch + fp32 temps."""
    x_blk = tm * H * itemsize                          # single-buffered x
    w_blks = 2 * (2 * H * ti + ti * H) * itemsize      # double-buffered wg/wu/wc
    out_blks = 2 * tm * H * itemsize                   # double-buffered output
    acc = tm * H * 4                                   # fp32 accumulator scratch
    temps = 3 * tm * ti * 4                            # fp32 gate / up / act
    return x_blk + w_blks + out_blks + acc + temps


def _select_tiles(S, H, I, itemsize, vmem_cap):
    """Generation-aware (tm, ti) defaults that fit the chip's VMEM."""
    usable = int(vmem_cap * 0.8)
    if vmem_cap >= 96 * _MIB:
        # v5e / v6e class (128 MiB VMEM): tm ~ 768 puts prefill past the
        # compute/bandwidth crossover (~650 flops/byte on v6e).
        tm_prefill, ti_target = 768, 512
    else:
        # v7x class (64 MiB VMEM): crossover ~310, keep the working set small.
        tm_prefill, ti_target = 384, 512

    # Decode-friendly: tm tracks the actual sequence length (bf16 sublane pair).
    tm = min(_round_up(max(S, 1), 16), tm_prefill)
    ti = min(ti_target, _round_up(I, 128))

    # Safety net: shrink until the working set fits (keeps ti a multiple of 128).
    while _vmem_need_bytes(tm, ti, H, itemsize) + 8 * _MIB > usable:
        if ti > 128:
            ti = max(128, ((ti // 2) // 128) * 128)
        elif tm > 16:
            tm = max(16, (tm // 2) // 8 * 8)
        else:
            break
    return tm, ti, usable


def qwen_mlp(x, w_gate, w_up, w_c_proj, *, seq_tile=None, inter_tile=None):
    """Fused QWenMLP forward.

    x:        [S, H]
    w_gate:   [H, I]
    w_up:     [H, I]
    w_c_proj: [I, H]
    returns:  [S, H]
    """
    S, H = x.shape
    Hg, I = w_gate.shape
    Hu, Iu = w_up.shape
    Ic, Hc = w_c_proj.shape
    assert H == Hg == Hu == Hc and I == Iu == Ic

    itemsize = jnp.dtype(x.dtype).itemsize
    vmem_cap = _vmem_capacity_bytes()
    tm_auto, ti_auto, usable = _select_tiles(S, H, I, itemsize, vmem_cap)
    tm = seq_tile if seq_tile is not None else tm_auto
    ti = inter_tile if inter_tile is not None else ti_auto
    assert tm % 8 == 0, "seq_tile must be a multiple of 8"
    assert ti % 128 == 0 or ti == I, "inter_tile must be a multiple of 128 (or == I)"

    # Zero-pad the reduction dim to a multiple of ti. Exact: zero gate/up
    # columns -> act == 0, and zero c_proj rows contribute nothing. In a real
    # serving stack this is done once at weight-load time.
    I_pad = _round_up(I, ti)
    if I_pad != I:
        w_gate = jnp.pad(w_gate, ((0, 0), (0, I_pad - I)))
        w_up = jnp.pad(w_up, ((0, 0), (0, I_pad - I)))
        w_c_proj = jnp.pad(w_c_proj, ((0, I_pad - I), (0, 0)))

    grid = (pl.cdiv(S, tm), I_pad // ti)
    n_seq_tiles = grid[0]

    need = _vmem_need_bytes(tm, ti, H, itemsize)
    vmem_limit = int(min(max(need + 16 * _MIB, 32 * _MIB), usable))

    cost = pl.CostEstimate(
        flops=6 * S * H * I_pad,                 # two H->I dots + one I->H dot
        transcendentals=S * I_pad,               # sigmoid
        bytes_accessed=itemsize * (2 * S * H + n_seq_tiles * 3 * H * I_pad),
    )

    def _call(x_spec):
        return pl.pallas_call(
            qwen_mlp_kernel,
            out_shape=jax.ShapeDtypeStruct((S, H), x.dtype),
            grid_spec=pltpu.PrefetchScalarGridSpec(
                num_scalar_prefetch=0,
                grid=grid,
                in_specs=[
                    x_spec,                                       # x seq tile
                    pl.BlockSpec((H, ti), lambda i, j: (0, j)),   # gate weight tile
                    pl.BlockSpec((H, ti), lambda i, j: (0, j)),   # up weight tile
                    pl.BlockSpec((ti, H), lambda i, j: (j, 0)),   # c_proj weight tile
                ],
                out_specs=pl.BlockSpec((tm, H), lambda i, j: (i, 0)),
                scratch_shapes=[pltpu.VMEM((tm, H), jnp.float32)],
            ),
            compiler_params=pltpu.CompilerParams(
                dimension_semantics=("parallel", "arbitrary"),
                vmem_limit_bytes=vmem_limit,
            ),
            cost_estimate=cost,
        )(x, w_gate, w_up, w_c_proj)

    # x only changes with the outer (seq) axis -> single buffer frees VMEM.
    x_spec_buffered = None
    try:
        x_spec_buffered = pl.BlockSpec(
            (tm, H), lambda i, j: (i, 0), pipeline_mode=pl.Buffered(buffer_count=1)
        )
    except TypeError:
        x_spec_buffered = None

    if x_spec_buffered is not None:
        try:
            return _call(x_spec_buffered)
        except Exception:
            pass  # fall back to default double-buffered x block

    return _call(pl.BlockSpec((tm, H), lambda i, j: (i, 0)))


def qwen_mlp_reference(x, w_gate, w_up, w_c_proj):
    xf = x.astype(jnp.float32)
    gate = jnp.dot(xf, w_gate.astype(jnp.float32))
    up = jnp.dot(xf, w_up.astype(jnp.float32))
    act = jax.nn.silu(gate) * up
    return jnp.dot(act, w_c_proj.astype(jnp.float32)).astype(x.dtype)


if __name__ == "__main__":
    def _run_case(key, S, H, I, dtype=jnp.bfloat16, **tile_kwargs):
        kx, kg, ku, kc = jax.random.split(key, 4)
        x = jax.random.normal(kx, (S, H), dtype=jnp.float32).astype(dtype)
        wg = (jax.random.normal(kg, (H, I), dtype=jnp.float32) * 0.05).astype(dtype)
        wu = (jax.random.normal(ku, (H, I), dtype=jnp.float32) * 0.05).astype(dtype)
        wc = (jax.random.normal(kc, (I, H), dtype=jnp.float32) * 0.05).astype(dtype)

        out = jax.block_until_ready(qwen_mlp(x, wg, wu, wc, **tile_kwargs))
        ref = qwen_mlp_reference(x, wg, wu, wc)
        assert out.shape == (S, H)
        assert jnp.allclose(out.astype(jnp.float32), ref.astype(jnp.float32),
                            atol=2.5e-2, rtol=2.5e-2), f"mismatch S={S} H={H} I={I}"

    root = jax.random.PRNGKey(0)
    k1, k2, k3 = jax.random.split(root, 3)

    # Multi-tile grid: 2 seq tiles x 2 reduction steps (exercises accumulator).
    _run_case(k1, S=16, H=128, I=256, seq_tile=8, inter_tile=128)
    # Partial last seq block (S=12 < tm=16) + intermediate padded 320 -> 384.
    _run_case(k2, S=12, H=128, I=320, inter_tile=128)
    # Fully automatic (generation-aware) tile selection path.
    _run_case(k3, S=16, H=128, I=256)

    print("KERNEL_OK")
</pallas_src>

<mosaic_0001>
module attributes {stable_mosaic.version = 11 : i64} {
  func.func @qwen_mlp_kernel(%arg0: i32, %arg1: i32, %arg2: memref<8x128xbf16, #tpu.memory_space<vmem>>, %arg3: memref<128x128xbf16, #tpu.memory_space<vmem>>, %arg4: memref<128x128xbf16, #tpu.memory_space<vmem>>, %arg5: memref<128x128xbf16, #tpu.memory_space<vmem>>, %arg6: memref<8x128xbf16, #tpu.memory_space<vmem>>, %arg7: memref<8x128xf32, #tpu.memory_space<vmem>>) attributes {dimension_semantics = [#tpu.dimension_semantics<parallel>, #tpu.dimension_semantics<arbitrary>], iteration_bounds = array<i64: 2, 2>, scalar_prefetch = 0 : i64, scratch_operands = 1 : i64, tpu.core_type = #tpu.core_type<tc>, window_params = [{pipeline_mode = #tpu.pipeline_mode<synchronous>, transform_indices = @transform_0, window_bounds = array<i64: 8, 128>}, {transform_indices = @transform_1, window_bounds = array<i64: 128, 128>}, {transform_indices = @transform_2, window_bounds = array<i64: 128, 128>}, {transform_indices = @transform_3, window_bounds = array<i64: 128, 128>}, {transform_indices = @transform_4, window_bounds = array<i64: 8, 128>}]} {
    %c0_i32 = arith.constant 0 : i32
    %0 = arith.cmpi eq, %arg1, %c0_i32 : i32
    %1 = arith.extui %0 : i1 to i32
    %c0_i32_0 = arith.constant 0 : i32
    %2 = arith.cmpi ne, %1, %c0_i32_0 : i32
    scf.if %2 {
      %cst_16 = arith.constant 0.000000e+00 : f32
      %24 = vector.broadcast %cst_16 : f32 to vector<8x128xf32>
      %c0_17 = arith.constant 0 : index
      %c0_18 = arith.constant 0 : index
      %25 = vector.load %arg7[%c0_17, %c0_18] : memref<8x128xf32, #tpu.memory_space<vmem>>, vector<8x128xf32>
      tpu.vector_store %arg7[%c0_17, %c0_18], %24 {strides = array<i32>} : memref<8x128xf32, #tpu.memory_space<vmem>>, vector<8x128xf32>,
    } else {
    }
    %c0 = arith.constant 0 : index
    %c0_1 = arith.constant 0 : index
    %3 = vector.load %arg2[%c0, %c0_1] : memref<8x128xbf16, #tpu.memory_space<vmem>>, vector<8x128xbf16>
    %c0_2 = arith.constant 0 : index
    %c0_3 = arith.constant 0 : index
    %4 = vector.load %arg3[%c0_2, %c0_3] : memref<128x128xbf16, #tpu.memory_space<vmem>>, vector<128x128xbf16>
    %cst = arith.constant dense<0.000000e+00> : vector<8x128xf32>
    %5 = tpu.matmul %3, %4, %cst {dimension_numbers = #tpu.dot_dimension_numbers<[1], [0], [0], [1], [0, 0, 1, 1], [], []>} : vector<8x128xbf16>, vector<128x128xbf16>, vector<8x128xf32> -> vector<8x128xf32>
    %c0_4 = arith.constant 0 : index
    %c0_5 = arith.constant 0 : index
    %6 = vector.load %arg4[%c0_4, %c0_5] : memref<128x128xbf16, #tpu.memory_space<vmem>>, vector<128x128xbf16>
    %cst_6 = arith.constant dense<0.000000e+00> : vector<8x128xf32>
    %7 = tpu.matmul %3, %6, %cst_6 {dimension_numbers = #tpu.dot_dimension_numbers<[1], [0], [0], [1], [0, 0, 1, 1], [], []>} : vector<8x128xbf16>, vector<128x128xbf16>, vector<8x128xf32> -> vector<8x128xf32>
    %8 = arith.negf %5 : vector<8x128xf32>
    %9 = math.exp %8 : vector<8x128xf32>
    %cst_7 = arith.constant 1.000000e+00 : f32
    %10 = vector.broadcast %cst_7 : f32 to vector<8x128xf32>
    %11 = arith.addf %10, %9 : vector<8x128xf32>
    %12 = arith.divf %10, %11 : vector<8x128xf32>
    %13 = arith.mulf %5, %12 : vector<8x128xf32>
    %14 = arith.mulf %13, %7 : vector<8x128xf32>
    %15 = arith.truncf %14 : vector<8x128xf32> to vector<8x128xbf16>
    %c0_8 = arith.constant 0 : index
    %c0_9 = arith.constant 0 : index
    %16 = vector.load %arg7[%c0_8, %c0_9] : memref<8x128xf32, #tpu.memory_space<vmem>>, vector<8x128xf32>
    %c0_10 = arith.constant 0 : index
    %c0_11 = arith.constant 0 : index
    %17 = vector.load %arg5[%c0_10, %c0_11] : memref<128x128xbf16, #tpu.memory_space<vmem>>, vector<128x128xbf16>
    %cst_12 = arith.constant dense<0.000000e+00> : vector<8x128xf32>
    %18 = tpu.matmul %15, %17, %cst_12 {dimension_numbers = #tpu.dot_dimension_numbers<[1], [0], [0], [1], [0, 0, 1, 1], [], []>} : vector<8x128xbf16>, vector<128x128xbf16>, vector<8x128xf32> -> vector<8x128xf32>
    %19 = arith.addf %16, %18 : vector<8x128xf32>
    %c0_13 = arith.constant 0 : index
    %c0_14 = arith.constant 0 : index
    %20 = vector.load %arg7[%c0_13, %c0_14] : memref<8x128xf32, #tpu.memory_space<vmem>>, vector<8x128xf32>
    tpu.vector_store %arg7[%c0_13, %c0_14], %19 {strides = array<i32>} : memref<8x128xf32, #tpu.memory_space<vmem>>, vector<8x128xf32>,
    %c1_i32 = arith.constant 1 : i32
    %21 = arith.cmpi eq, %arg1, %c1_i32 : i32
    %22 = arith.extui %21 : i1 to i32
    %c0_i32_15 = arith.constant 0 : i32
    %23 = arith.cmpi ne, %22, %c0_i32_15 : i32
    scf.if %23 {
      %c0_16 = arith.constant 0 : index
      %c0_17 = arith.constant 0 : index
      %24 = vector.load %arg7[%c0_16, %c0_17] : memref<8x128xf32, #tpu.memory_space<vmem>>, vector<8x128xf32>
      %25 = arith.truncf %24 : vector<8x128xf32> to vector<8x128xbf16>
      %c0_18 = arith.constant 0 : index
      %c0_19 = arith.constant 0 : index
      %26 = vector.load %arg6[%c0_18, %c0_19] : memref<8x128xbf16, #tpu.memory_space<vmem>>, vector<8x128xbf16>
      tpu.vector_store %arg6[%c0_18, %c0_19], %25 {strides = array<i32>} : memref<8x128xbf16, #tpu.memory_space<vmem>>, vector<8x128xbf16>,
    } else {
    }
    return
  }
  func.func @transform_0(%arg0: i32, %arg1: i32) -> (i32, i32) {
    %c0_i32 = arith.constant 0 : i32
    %c0_i32_0 = arith.constant 0 : i32
    return %arg0, %c0_i32 : i32, i32
  }
  func.func @transform_1(%arg0: i32, %arg1: i32) -> (i32, i32) {
    %c0_i32 = arith.constant 0 : i32
    %c0_i32_0 = arith.constant 0 : i32
    return %c0_i32, %arg1 : i32, i32
  }
  func.func @transform_2(%arg0: i32, %arg1: i32) -> (i32, i32) {
    %c0_i32 = arith.constant 0 : i32
    %c0_i32_0 = arith.constant 0 : i32
    return %c0_i32, %arg1 : i32, i32
  }
  func.func @transform_3(%arg0: i32, %arg1: i32) -> (i32, i32) {
    %c0_i32 = arith.constant 0 : i32
    %c0_i32_0 = arith.constant 0 : i32
    return %arg1, %c0_i32 : i32, i32
  }
  func.func @transform_4(%arg0: i32, %arg1: i32) -> (i32, i32) {
    %c0_i32 = arith.constant 0 : i32
    %c0_i32_0 = arith.constant 0 : i32
    return %arg0, %c0_i32 : i32, i32
  }
}

module attributes {stable_mosaic.version = 11 : i64} {
  func.func @qwen_mlp_kernel(%arg0: i32, %arg1: i32, %arg2: memref<8x128xbf16, #tpu.memory_space<vmem>>, %arg3: memref<128x128xbf16, #tpu.memory_space<vmem>>, %arg4: memref<128x128xbf16, #tpu.memory_space<vmem>>, %arg5: memref<128x128xbf16, #tpu.memory_space<vmem>>, %arg6: memref<8x128xbf16, #tpu.memory_space<vmem>>, %arg7: memref<8x128xf32, #tpu.memory_space<vmem>>) attributes {dimension_semantics = [#tpu.dimension_semantics<parallel>, #tpu.dimension_semantics<arbitrary>], iteration_bounds = array<i64: 2, 2>, scalar_prefetch = 0 : i64, scratch_operands = 1 : i64, tpu.core_type = #tpu.core_type<tc>, window_params = [{transform_indices = @transform_0, window_bounds = array<i64: 8, 128>}, {transform_indices = @transform_1, window_bounds = array<i64: 128, 128>}, {transform_indices = @transform_2, window_bounds = array<i64: 128, 128>}, {transform_indices = @transform_3, window_bounds = array<i64: 128, 128>}, {transform_indices = @transform_4, window_bounds = array<i64: 8, 128>}]} {
    %c0_i32 = arith.constant 0 : i32
    %0 = arith.cmpi eq, %arg1, %c0_i32 : i32
    %1 = arith.extui %0 : i1 to i32
    %c0_i32_0 = arith.constant 0 : i32
    %2 = arith.cmpi ne, %1, %c0_i32_0 : i32
    scf.if %2 {
      %cst_16 = arith.constant 0.000000e+00 : f32
      %24 = vector.broadcast %cst_16 : f32 to vector<8x128xf32>
      %c0_17 = arith.constant 0 : index
      %c0_18 = arith.constant 0 : index
      %25 = vector.load %arg7[%c0_17, %c0_18] : memref<8x128xf32, #tpu.memory_space<vmem>>, vector<8x128xf32>
      tpu.vector_store %arg7[%c0_17, %c0_18], %24 {strides = array<i32>} : memref<8x128xf32, #tpu.memory_space<vmem>>, vector<8x128xf32>,
    } else {
    }
    %c0 = arith.constant 0 : index
    %c0_1 = arith.constant 0 : index
    %3 = vector.load %arg2[%c0, %c0_1] : memref<8x128xbf16, #tpu.memory_space<vmem>>, vector<8x128xbf16>
    %c0_2 = arith.constant 0 : index
    %c0_3 = arith.constant 0 : index
    %4 = vector.load %arg3[%c0_2, %c0_3] : memref<128x128xbf16, #tpu.memory_space<vmem>>, vector<128x128xbf16>
    %cst = arith.constant dense<0.000000e+00> : vector<8x128xf32>
    %5 = tpu.matmul %3, %4, %cst {dimension_numbers = #tpu.dot_dimension_numbers<[1], [0], [0], [1], [0, 0, 1, 1], [], []>} : vector<8x128xbf16>, vector<128x128xbf16>, vector<8x128xf32> -> vector<8x128xf32>
    %c0_4 = arith.constant 0 : index
    %c0_5 = arith.constant 0 : index
    %6 = vector.load %arg4[%c0_4, %c0_5] : memref<128x128xbf16, #tpu.memory_space<vmem>>, vector<128x128xbf16>
    %cst_6 = arith.constant dense<0.000000e+00> : vector<8x128xf32>
    %7 = tpu.matmul %3, %6, %cst_6 {dimension_numbers = #tpu.dot_dimension_numbers<[1], [0], [0], [1], [0, 0, 1, 1], [], []>} : vector<8x128xbf16>, vector<128x128xbf16>, vector<8x128xf32> -> vector<8x128xf32>
    %8 = arith.negf %5 : vector<8x128xf32>
    %9 = math.exp %8 : vector<8x128xf32>
    %cst_7 = arith.constant 1.000000e+00 : f32
    %10 = vector.broadcast %cst_7 : f32 to vector<8x128xf32>
    %11 = arith.addf %10, %9 : vector<8x128xf32>
    %12 = arith.divf %10, %11 : vector<8x128xf32>
    %13 = arith.mulf %5, %12 : vector<8x128xf32>
    %14 = arith.mulf %13, %7 : vector<8x128xf32>
    %15 = arith.truncf %14 : vector<8x128xf32> to vector<8x128xbf16>
    %c0_8 = arith.constant 0 : index
    %c0_9 = arith.constant 0 : index
    %16 = vector.load %arg7[%c0_8, %c0_9] : memref<8x128xf32, #tpu.memory_space<vmem>>, vector<8x128xf32>
    %c0_10 = arith.constant 0 : index
    %c0_11 = arith.constant 0 : index
    %17 = vector.load %arg5[%c0_10, %c0_11] : memref<128x128xbf16, #tpu.memory_space<vmem>>, vector<128x128xbf16>
    %cst_12 = arith.constant dense<0.000000e+00> : vector<8x128xf32>
    %18 = tpu.matmul %15, %17, %cst_12 {dimension_numbers = #tpu.dot_dimension_numbers<[1], [0], [0], [1], [0, 0, 1, 1], [], []>} : vector<8x128xbf16>, vector<128x128xbf16>, vector<8x128xf32> -> vector<8x128xf32>
    %19 = arith.addf %16, %18 : vector<8x128xf32>
    %c0_13 = arith.constant 0 : index
    %c0_14 = arith.constant 0 : index
    %20 = vector.load %arg7[%c0_13, %c0_14] : memref<8x128xf32, #tpu.memory_space<vmem>>, vector<8x128xf32>
    tpu.vector_store %arg7[%c0_13, %c0_14], %19 {strides = array<i32>} : memref<8x128xf32, #tpu.memory_space<vmem>>, vector<8x128xf32>,
    %c1_i32 = arith.constant 1 : i32
    %21 = arith.cmpi eq, %arg1, %c1_i32 : i32
    %22 = arith.extui %21 : i1 to i32
    %c0_i32_15 = arith.constant 0 : i32
    %23 = arith.cmpi ne, %22, %c0_i32_15 : i32
    scf.if %23 {
      %c0_16 = arith.constant 0 : index
      %c0_17 = arith.constant 0 : index
      %24 = vector.load %arg7[%c0_16, %c0_17] : memref<8x128xf32, #tpu.memory_space<vmem>>, vector<8x128xf32>
      %25 = arith.truncf %24 : vector<8x128xf32> to vector<8x128xbf16>
      %c0_18 = arith.constant 0 : index
      %c0_19 = arith.constant 0 : index
      %26 = vector.load %arg6[%c0_18, %c0_19] : memref<8x128xbf16, #tpu.memory_space<vmem>>, vector<8x128xbf16>
      tpu.vector_store %arg6[%c0_18, %c0_19], %25 {strides = array<i32>} : memref<8x128xbf16, #tpu.memory_space<vmem>>, vector<8x128xbf16>,
    } else {
    }
    return
  }
  func.func @transform_0(%arg0: i32, %arg1: i32) -> (i32, i32) {
    %c0_i32 = arith.constant 0 : i32
    %c0_i32_0 = arith.constant 0 : i32
    return %arg0, %c0_i32 : i32, i32
  }
  func.func @transform_1(%arg0: i32, %arg1: i32) -> (i32, i32) {
    %c0_i32 = arith.constant 0 : i32
    %c0_i32_0 = arith.constant 0 : i32
    return %c0_i32, %arg1 : i32, i32
  }
  func.func @transform_2(%arg0: i32, %arg1: i32) -> (i32, i32) {
    %c0_i32 = arith.constant 0 : i32
    %c0_i32_0 = arith.constant 0 : i32
    return %c0_i32, %arg1 : i32, i32
  }
  func.func @transform_3(%arg0: i32, %arg1: i32) -> (i32, i32) {
    %c0_i32 = arith.constant 0 : i32
    %c0_i32_0 = arith.constant 0 : i32
    return %arg1, %c0_i32 : i32, i32
  }
  func.func @transform_4(%arg0: i32, %arg1: i32) -> (i32, i32) {
    %c0_i32 = arith.constant 0 : i32
    %c0_i32_0 = arith.constant 0 : i32
    return %arg0, %c0_i32 : i32, i32
  }
}

</mosaic_0001>

<bundles_post_ra>
// kernel: tpu_custom_call.1
= control target key start
LH: loop header
LB: loop body
LE: loop exit
PB: predicated region body
PF: predicated region fallthrough
CT: control target
= control target key end

     0   :  { %s1627_s0 = inlined_call_operand.hbm [shape: bf16[16,128], index: 0, kind: input, shape index: {}]   ;;  %s1628_s1 = inlined_call_operand.hbm [shape: bf16[128,256], index: 1, kind: input, shape index: {}]   ;;  %s1629_s2 = inlined_call_operand.hbm [shape: bf16[128,256], index: 2, kind: input, shape index: {}]   ;;  %s1630_s3 = inlined_call_operand.hbm [shape: bf16[256,128], index: 3, kind: input, shape index: {}]   ;;  %s1631_s4 = inlined_call_operand.hbm [shape: bf16[16,128], index: 4, kind: output, shape index: {}]  }
   0x1   :  { %1646 = sst [smem:[#allocation25_spill]] %s1627_s0 }
   0x2   :  { %1647 = sst [smem:[#allocation26_spill]] %s1628_s1 }
   0x3   :  { %1648 = sst [smem:[#allocation27_spill]] %s1629_s2 }
   0x4   :  { %1649 = sst [smem:[#allocation28_spill]] %s1631_s4 }
   0x5   :  { %9 = vsyncpa [#allocation4], 0 }
   0x6   :  { %10 = vsyncpa [#allocation7], 0 }
   0x7   :  { %12 = vsyncpa [#allocation7 + $0x1], 0 }
   0x8   :  { %13 = vsyncpa [#allocation10], 0 }
   0x9   :  { %15 = vsyncpa [#allocation10 + $0x1], 0 }
   0xa   :  { %16 = vsyncpa [#allocation5], 0 }
   0xb   :  { %18 = vsyncpa [#allocation5 + $0x1], 0  ;;  %s1309_s15 = smov 0   ;;  %s1311_s16 = smov 0  }
   0xc   :  { %s1313_s17 = smov 0   ;;  %s1315_s18 = smov 0  }
   0xd   :  { %s1317_s19 = smov 0   ;;  %s1319_s20 = smov 0  }
   0xe   :  { %s1321_s21 = smov 0   ;;  %s1323_s22 = smov 0  }
   0xf   :  { %s1325_s23 = smov 0   ;;  %s1327_s24 = smov 0  }
  0x10   :  { %s1329_s25 = smov 0  }
  0x11 LB: > { %1650 = sst [smem:[#allocation16_spill]] %s1249_s18  ;;  %s33_s26 = sadd.s32 1, %s1269_s23  ;;  %s1277_s25 = sphi %s1329_s25, %s24_s25   ;;  %s1273_s24 = sphi %s1327_s24, %s1687_s24   ;;  %s1269_s23 = sphi %s1325_s23, %s1694_s23   ;;  %s1265_s22 = sphi %s1323_s22, %s1685_s22   ;;  %s1261_s21 = sphi %s1321_s21, %s1693_s21   ;;  %s1257_s20 = sphi %s1319_s20, %s1684_s20   ;;  %s1253_s19 = sphi %s1317_s19, %s1692_s19   ;;  %s1249_s18 = sphi %s1315_s18, %s1691_s18   ;;  %s1245_s17 = sphi %s1313_s17, %s1690_s17   ;;  %s1241_s16 = sphi %s1311_s16, %s1689_s16   ;;  %s1237_s15 = sphi %s1309_s15, %s1688_s15  }
  0x12   : > { %1651 = sst [smem:[#allocation17_spill]] %s1257_s20  ;;  %s69_s27 = sadd.s32 1, %s1245_s17 }
  0x13   : > { %1652 = sst [smem:[#allocation18_spill]] %s1261_s21  ;;  %p1366_p0 = scmp.ge.s32.totalorder %s33_s26, 2 }
  0x14   : > { %1653 = sst [smem:[#allocation19_spill]] %s1273_s24  ;;  %p76_p1 = scmp.ne.s32.totalorder %s1245_s17, %s1241_s16 }
  0x15   : > { %p77_p2 = scmp.eq.s32.totalorder %s1277_s25, 0  ;;  %s1696_s26 = smov (%p1366_p0, %s33_s26), 0 }
  0x16   : > { %1655 = sst [smem:[#allocation20_spill]] %s1696_s26  ;;  %p928_p4 = scmp.lt.s32.totalorder %s1277_s25, 4 }
  0x17   : > { %p1377_p3 = por %p77_p2, %p76_p1  ;;  %s66_s30 = ssub.s32 %s1269_s23, %s1696_s26 }
  0x18   : > { %s198_s5 = sand.u32 1, %s1277_s25   ;;  %p67_p5 = scmp.eq.s32.totalorder %s66_s30, 0 }
  0x19   : > { %s1632_s6 = sand.u32 1, %s1245_s17   ;;  %s761_s7 = sshll.u32 %s1269_s23, 2 }
  0x1a   : > { %s1388_s8 = scalar_select %p67_p5, %s1245_s17, %s69_s27  }
  0x1b   : > { %s1392_s9 = sshll.u32 %s1632_s6, 6  ;;  %s1658_s1 = sld [smem:[#allocation26_spill]] }
  0x1c   : > { %1657 = sst [smem:[#allocation21_spill]] %s1388_s8  ;;  %s202_s14 = scalar_lea.vmem [#allocation6], %s1392_s9 }
  0x1d   : > { %s209_s30 = sshll.u32 %s202_s14, 4  ;;  %p1402_p6 = pnand %p928_p4, %p1377_p3  ;;  %s210_s30 = int_to_ptr.vmem [resolvable:$true] %s209_s30 }
  0x1e   : > { %s1406_s10 = scalar_lea.sflag [#allocation7], %s198_s5  ;;  %s1635_s11 = smov 128  }
  0x1f   : > { %s1638_s14 = smov 4   ;;  %s1660_s2 = sld [smem:[#allocation27_spill]] }
  0x20   : > { %s1420_s26 = sadd.s32 4294967295, %s1277_s25   ;;  %s756_s8 = sadd.s32 4294967294, %s1277_s25  }
  0x21   : > { %s206_s12 = scalar_lea.hbm %s1658_s1, %s761_s7  ;;  %s36_s4 = sadd.s32 1, %s1273_s24 }
  0x22   : > { %s207_s13 = sshll.u32 %s206_s12, 4  ;;  %s1636_s12 = smov 64   ;;  %s208_s13 = int_to_ptr.hbm [resolvable:$true] %s207_s13 }
  0x23   : > { %917 = dma.hbm_to_vmem [thread:$0]  (!%p1402_p6), %s208_s13, 1024, %s210_s30, %s1406_s10, %s1635_s11, %s1636_s12, %s1638_s14  }
  0x24   : > { %s1698_s4 = smov (!%p1366_p0, %s36_s4), %s1273_s24  ;;  %s43_s21 = sadd.s32 1, %s1257_s20 }
  0x25   : > { %s227_s5 = scalar_lea.hbm %s1660_s2, %s761_s7  ;;  %p56_p7 = scmp.ne.s32.totalorder %s1253_s19, %s1249_s18 }
  0x26   : > { %s228_s1 = sshll.u32 %s227_s5, 4  ;;  %p38_p8 = scmp.ge.s32.totalorder %s1698_s4, 2  ;;  %s1417_s1 = int_to_ptr.hbm [resolvable:$true] %s228_s1 }
  0x27   : > { %p57_p9 = scmp.eq.s32.totalorder %s1420_s26, 0  ;;  %p82_p10 = scmp.ne.s32.totalorder %s1241_s16, %s1237_s15 }
  0x28   : > { %p157_p11 = scmp.ne.s32.totalorder %s1257_s20, %s1253_s19  ;;  %s1700_s4 = smov (%p38_p8, %s1698_s4), 0 }
  0x29   : > { %1661 = sst [smem:[#allocation22_spill]] %s1700_s4  ;;  %p1440_p12 = por %p57_p9, %p56_p7 }
  0x2a   : > { %p1444_p13 = por %p82_p10, %p57_p9  ;;  %s40_s7 = ssub.s32 %s1273_s24, %s1700_s4 }
  0x2b   : > { %p158_p0 = scmp.eq.s32.totalorder %s1420_s26, 3  ;;  %p41_p1 = scmp.eq.s32.totalorder %s40_s7, 0 }
  0x2c   : > { %p164_p2 = scmp.eq.s32.totalorder %s756_s8, 3  ;;  %p757_p4 = scmp.ge.s32.totalorder %s1277_s25, 1 }
  0x2d   : > { %p1451_p3 = por %p158_p0, %p157_p11  ;;  %p171_p8 = scmp.lt.s32.totalorder %s1277_s25, 5 }
  0x2e   : > { %s1457_s13 = scalar_select %p41_p1, %s1257_s20, %s43_s21  }
  0x2f   : > { %p1462_p5 = por %p164_p2, %p56_p7  ;;  %s1642_s29 = sshll.u32 %s1265_s22, 2 }
  0x30   : > { %1665 = sst [smem:[#allocation23_spill]] %s1457_s13  ;;  %p1468_p9 = pnand %p757_p4, %p171_p8 }
  0x31   : > { %s1666_s30 = scalar_select %p1462_p5, 1, 0 }
  0x32   : > { %s1669_s0 = sld [smem:[#allocation25_spill]]  ;;  %s1282_s21 = smov [#allocation3]  }
  0x33   : > { %1667 = sst [smem:[#allocation24_spill]] %s1666_s30  ;;  %s187_s14 = sshll.u32 %s1282_s21, 4  ;;  %s188_s14 = int_to_ptr.vmem [resolvable:$true] %s187_s14 }
  0x34   : > { %p910_p7 = pneg %p1468_p9  ;;  %s223_s4 = scalar_lea.vmem [#allocation8], %s1392_s9 }
  0x35   : > { %s230_s24 = sshll.u32 %s223_s4, 4  ;;  %s231_s24 = int_to_ptr.vmem [resolvable:$true] %s230_s24 }
  0x36   : > { %p1481_p10 = pnand %p910_p7, %p1440_p12 }
  0x38   : > { %s183_s11 = scalar_lea.hbm %s1669_s0, %s1642_s29  ;;  %p1061_p0 = pneg %p1481_p10 }
  0x39   : > { %s185_s12 = sshll.u32 %s183_s11, 4  ;;  %s1064_s21 = scalar_lea.hbm %s1669_s0, 8  ;;  %s186_s12 = int_to_ptr.hbm [resolvable:$true] %s185_s12 }
  0x3a   : > { %s1057_s13 = sshra.s32 %s186_s12, 4  ;;  %s1058_s13 = int_to_ptr.hbm [resolvable:$true] %s1057_s13 }
  0x3b   : > { %s1059_s8 = scalar_lea.hbm %s1058_s13, 4  ;;  %p1065_p4 = scmp.lt.s32.totalorder %s1058_s13, %s1669_s0 }
  0x3c   : > { %p1060_p11 = scmp.ne.s32.totalorder %s1058_s13, %s1059_s8  ;;  %p1066_p8 = scmp.lt.s32.totalorder %s1064_s21, %s1059_s8 }
  0x3e   : > { %p1062_p1 = pnand %p1061_p0, %p1060_p11  ;;  %p1067_p7 = por %p1066_p8, %p1065_p4 }
  0x40   : > { %p1063_p2 = pneg %p1062_p1 }
  0x42   : > { %p1068_p5 = pnand %p1067_p7, %p1063_p2 }
  0x44   : > { %1071 = shalt.err (!%p1068_p5)
}
  0x45   : > { %913 = dma.hbm_to_vmem [thread:$0]  (!%p1481_p10), %s186_s12, 64, %s188_s14, [#allocation4]  }
  0x46   : > { %s1671_s4 = smov 4   ;;  %s1672_s11 = smov 64  }
  0x47   : > { %s1673_s7 = smov 128   ;;  %s875_s20 = sshll.u32 %s1269_s23, 6 }
  0x48   : > { %920 = dma.hbm_to_vmem [thread:$0]  (!%p1402_p6), %s1417_s1, 1024, %s231_s24, %s1406_s10, %s1673_s7, %s1672_s11, %s1671_s4  }
  0x49   : > { %s244_s13 = scalar_lea.vmem [#allocation9], %s1392_s9  ;;  %s249_s2 = scalar_lea.hbm %s1630_s3, %s875_s20 }
  0x4a   : > { %s252_s29 = sshll.u32 %s244_s13, 4  ;;  %s250_s0 = sshll.u32 %s249_s2, 4  ;;  %s253_s29 = int_to_ptr.vmem [resolvable:$true] %s252_s29  ;;  %s251_s0 = int_to_ptr.hbm [resolvable:$true] %s250_s0 }
  0x4b   : > { %s1674_s30 = sand.u32 1, %s1245_s17   ;;  %264 = sbr.rel (%p1468_p9) target bundleno = 460 (0x1cc), region = 36 }
  0x4c   : > { %s241_s18 = scalar_lea.sflag [#allocation10], %s1674_s30 }
  0x4d   : > { %923 = dma.hbm_to_vmem [thread:$0]  (!%p1402_p6), %s251_s0, 1024, %s253_s29, %s241_s18, %s1672_s11, %s1672_s11, %s1671_s4  }
  0x50   : > { %1220 = dma.done.wait (%p1440_p12), [#allocation4], 64  }
  0x51   : > { %1222 = vsyncadd (%p1440_p12), [#allocation4], 4294967232  ;;  %s271_s1 = sand.u32 1, %s1420_s26   ;;  %s273_s24 = sand.u32 1, %s1241_s16  }
  0x52   : > { %s768_s9 = sshll.u32 %s273_s24, 6  ;;  %s272_s27 = scalar_lea.sflag [#allocation7], %s271_s1 }
  0x53   : > { %s1523_s10 = scalar_lea.vmem [#allocation6], %s768_s9 }
  0x54   : > { %1224 = dma.done.wait (%p1444_p13), %s272_s27, 2048  }
  0x55   : > { %1226 = vsyncadd (%p1444_p13), %s272_s27, 4294965248  ;;  %s1529_s0 = scalar_lea.vmem [#allocation8], %s768_s9  ;;  %s292_s18 = scalar_lea.sflag [#allocation10], %s273_s24 }
  0x56   : > { %s1531_s12 = scalar_lea.vmem [#allocation9], %s768_s9 }
  0x57   : > { %1228 = dma.done.wait (%p1444_p13), %s292_s18, 1024  }
  0x58   : > { %1230 = vsyncadd (%p1444_p13), %s292_s18, 4294966272  ;;  %s328_s26 = sand.u32 1, %s1253_s19   ;;  %s1675_s30 = sld [smem:[#allocation18_spill]] }
  0x59   : > { %s1540_s14 = sshll.u32 %s328_s26, 2 }
  0x5a   : > { %s330_s28 = scalar_lea.vmem [#allocation11], %s1540_s14 }
  0x5e   : > { %p772_p6 = scmp.ne.s32.totalorder %s1675_s30, 0 }
  0x60   : > { %335 = sbr.rel (%p772_p6) target bundleno = 103 (0x67), region = 56 }
  0x65   : > { %v1283_v0 = vmov 0.0  }
  0x66   : > { %336 = vst [vmem:[#allocation2] sm:$0xff] %v1283_v0 }
  0x67 PF: > { %v883_v1 = vld [vmem:[%s1523_s10 + $0x38] sm:$0xff]  ;;  %v882_v2 = vld [vmem:[%s1523_s10 + $0x30] sm:$0xff]  ;;  %v881_v5 = vld [vmem:[%s1523_s10 + $0x28] sm:$0xff]  ;;  %s1676_s6 = sld [smem:[#allocation18_spill]] }
  0x68   : > { %402 = vmatpush.bf16.msra.mxu0 %v883_v1  ;;  %v891_v3 = vld [vmem:[%s1529_s0 + $0x38] sm:$0xff]  ;;  %v890_v4 = vld [vmem:[%s1529_s0 + $0x30] sm:$0xff]  ;;  %v889_v6 = vld [vmem:[%s1529_s0 + $0x28] sm:$0xff] }
  0x69   : > { %479 = vmatpush.bf16.msra.mxu1 %v891_v3  ;;  %v880_v7 = vld [vmem:[%s1523_s10 + $0x20] sm:$0xff]  ;;  %v879_v9 = vld [vmem:[%s1523_s10 + $0x18] sm:$0xff]  ;;  %v878_v11 = vld [vmem:[%s1523_s10 + $0x10] sm:$0xff] }
  0x6a   : > { %v888_v8 = vld [vmem:[%s1529_s0 + $0x20] sm:$0xff]  ;;  %v887_v10 = vld [vmem:[%s1529_s0 + $0x18] sm:$0xff]  ;;  %v886_v12 = vld [vmem:[%s1529_s0 + $0x10] sm:$0xff] }
  0x6b   : > { %v877_v13 = vld [vmem:[%s1523_s10 + $0x8] sm:$0xff]  ;;  %v876_v15 = vld [vmem:[%s1523_s10] sm:$0xff]  ;;  %v337_v17 = vld [vmem:[#allocation3] sm:$0xf] }
  0x6c   : > { %403 = vmatpush.bf16.msra.mxu0 %v882_v2  ;;  %v885_v14 = vld [vmem:[%s1529_s0 + $0x8] sm:$0xff]  ;;  %v884_v16 = vld [vmem:[%s1529_s0] sm:$0xff]  ;;  %v899_v18 = vld [vmem:[%s1531_s12 + $0x38] sm:$0xff] }
  0x6d   : > { %480 = vmatpush.bf16.msra.mxu1 %v890_v4  ;;  %579 = vmatpush.bf16.msra.mxu2 %v899_v18  ;;  %v898_v19 = vld [vmem:[%s1531_s12 + $0x30] sm:$0xff]  ;;  %v897_v20 = vld [vmem:[%s1531_s12 + $0x28] sm:$0xff]  ;;  %v896_v21 = vld [vmem:[%s1531_s12 + $0x20] sm:$0xff]  ;;  %p870_p12 = scmp.ne.s32.totalorder %s1676_s6, 1 }
  0x6e   : > { %v895_v22 = vld [vmem:[%s1531_s12 + $0x18] sm:$0xff]  ;;  %v894_v23 = vld [vmem:[%s1531_s12 + $0x10] sm:$0xff]  ;;  %v893_v24 = vld [vmem:[%s1531_s12 + $0x8] sm:$0xff] }
  0x6f   : > { %v892_v25 = vld [vmem:[%s1531_s12] sm:$0xff]  ;;  %v514_v46 = vld [vmem:[#allocation2] sm:$0xff] }
  0x70   : > { %404 = vmatpush.bf16.msra.mxu0 %v881_v5 }
  0x71   : > { %481 = vmatpush.bf16.msra.mxu1 %v889_v6  ;;  %580 = vmatpush.bf16.msra.mxu2 %v898_v19 }
  0x74   : > { %405 = vmatpush.bf16.msra.mxu0 %v880_v7 }
  0x75   : > { %482 = vmatpush.bf16.msra.mxu1 %v888_v8  ;;  %581 = vmatpush.bf16.msra.mxu2 %v897_v20 }
  0x78   : > { %406 = vmatpush.bf16.msra.mxu0 %v879_v9 }
  0x79   : > { %483 = vmatpush.bf16.msra.mxu1 %v887_v10  ;;  %582 = vmatpush.bf16.msra.mxu2 %v896_v21 }
  0x7c   : > { %407 = vmatpush.bf16.msra.mxu0 %v878_v11 }
  0x7d   : > { %484 = vmatpush.bf16.msra.mxu1 %v886_v12  ;;  %583 = vmatpush.bf16.msra.mxu2 %v895_v22 }
  0x80   : > { %408 = vmatpush.bf16.msra.mxu0 %v877_v13 }
  0x81   : > { %485 = vmatpush.bf16.msra.mxu1 %v885_v14  ;;  %584 = vmatpush.bf16.msra.mxu2 %v894_v23 }
  0x84   : > { %409 = vmatpush.bf16.msra.mxu0 %v876_v15 }
  0x85   : > { %486 = vmatpush.bf16.msra.mxu1 %v884_v16  ;;  %585 = vmatpush.bf16.msra.mxu2 %v893_v24 }
  0x87   : > { %410 = vmatmul.bf16.vlgmr.msra.gmra.mxu0 %v337_v17 }
  0x88   : > { %487 = vmatmul.bf16.vlgmr.msra.gmra.mxu1 %v337_v17 }
  0x89   : > { %586 = vmatpush.bf16.msra.mxu2 %v892_v25 }
 0x104   : > { %v411_v26 = vpop.f32.mrf.mxu0 }
 0x105   : > { %v837_v27 = vmul.f32 -1.442695, %v411_v26  ;;  %v488_v28 = vpop.f32.mrf.mxu1 }
 0x107   : > { %1023 = vpow2.f32 %v837_v27 }
 0x10c   : > { %v413_v29 = vpop.f32.mrf.mxu0 }
 0x10d   : > { %v1024_v30 = vpop.eup %1023  ;;  %v490_v32 = vpop.f32.mrf.mxu1 }
 0x10e   : > { %v495_v31 = vadd.f32 1.0, %v1024_v30 }
 0x110   : > { %1025 = vrcp.f32 %v495_v31  ;;  %v507_v36 = vand.u32 2147483648, %v495_v31  ;;  %v505_v38 = vand.u32 2147483647, %v495_v31  ;;  %vm501_vm1 = vweird.f32 %v495_v31 }
 0x112   : > { %v508_v40 = vor.u32 1.1754944e-38, %v507_v36  ;;  %vm506_vm3 = vcmp.eq.f32.partialorder %v505_v38, 8.507059e+37 }
 0x116   : > { %v1026_v33 = vpop.eup %1025 }
 0x117   : > { %v497_v34 = vmul.f32 %v1026_v33, %v495_v31  ;;  %vm502_vm0 = vweird.f32 %v1026_v33 }
 0x118   : > { %vm503_vm2 = vmor %vm501_vm1, %vm502_vm0 }
 0x119   : > { %v498_v35 = vsub.f32 1.0, %v497_v34 }
 0x11b   : > { %v499_v37 = vmul.f32 %v1026_v33, %v498_v35 }
 0x11d   : > { %v500_v39 = vadd.f32 %v1026_v33, %v499_v37 }
 0x11f   : > { %v504_v41 = vsel %vm503_vm2, %v1026_v33, %v500_v39 }
 0x120   : > { %v509_v42 = vsel %vm506_vm3, %v508_v40, %v504_v41 }
 0x121   : > { %v511_v43 = vmul.f32 %v509_v42, %v411_v26 }
 0x123   : > { %v512_v44 = vmul.f32 %v511_v43, %v488_v28 }
 0x125   : > { %v513_v45 = vpack.c.bf16 %v512_v44, %v512_v44 }
 0x127   : > { %587 = vmatmul.bf16.vlgmr.msra.gmra.mxu2 %v513_v45 }
 0x1aa   : > { %v588_v47 = vpop.f32.mrf.mxu2 }
 0x1ab   : > { %v592_v48 = vadd.f32 %v588_v47, %v514_v46 }
 0x1ad   : > { %593 = vst [vmem:[#allocation2] sm:$0xff] %v592_v48 }
 0x1ae   : > { %597 = sbr.rel (%p870_p12) target bundleno = 440 (0x1b8), region = 60 }
 0x1b2   : > { %v590_v49 = vpop.f32.mrf.mxu2 }
 0x1b4   : > { %v598_v50 = vld [vmem:[#allocation2] sm:$0xff] }
 0x1b5   : > { %v599_v51 = vpack.c.bf16 %v598_v50, %v598_v50 }
 0x1b7   : > { %600 = vst [vmem:[%s330_s28] sm:$0xf] %v599_v51 }
 0x1b8 PF: > { %s1677_s5 = sshll.u32 %s1265_s22, 2  ;;  %s1678_s7 = sld [smem:[#allocation28_spill]] }
 0x1b9   : > { %s614_s13 = sshll.u32 %s330_s28, 4  ;;  %s602_s8 = scalar_lea.sflag [#allocation5], %s328_s26  ;;  %s615_s13 = int_to_ptr.vmem [resolvable:$true] %s614_s13 }
 0x1be   : > { %s612_s20 = scalar_lea.hbm %s1678_s7, %s1677_s5  ;;  %s1167_s24 = scalar_lea.hbm %s1678_s7, 8 }
 0x1bf   : > { %s616_s29 = sshll.u32 %s612_s20, 4  ;;  %s617_s29 = int_to_ptr.hbm [resolvable:$true] %s616_s29 }
 0x1c0   : > { %s1161_s21 = sshra.s32 %s617_s29, 4  ;;  %s1162_s21 = int_to_ptr.hbm [resolvable:$true] %s1161_s21 }
 0x1c1   : > { %s1163_s2 = scalar_lea.hbm %s1162_s21, 4  ;;  %p1168_p10 = scmp.lt.s32.totalorder %s1162_s21, %s1678_s7 }
 0x1c2   : > { %p1164_p13 = scmp.ne.s32.totalorder %s1162_s21, %s1163_s2  ;;  %p1169_p11 = scmp.lt.s32.totalorder %s1167_s24, %s1163_s2 }
 0x1c4   : > { %p1165_p5 = pnand %p1164_p13, %p1451_p3  ;;  %p1170_p0 = por %p1169_p11, %p1168_p10 }
 0x1c6   : > { %p1166_p9 = pneg %p1165_p5 }
 0x1c8   : > { %p1171_p1 = pnand %p1170_p0, %p1166_p9 }
 0x1ca   : > { %1174 = shalt.err (!%p1171_p1)
}
 0x1cb   : > { %908 = dma.vmem_to_hbm [thread:$0]  (%p1451_p3), %s615_s13, 64, %s617_s29, %s602_s8  }
 0x1cc PF: > { %s1679_s10 = sld [smem:[#allocation16_spill]]  ;;  %p929_p2 = scmp.ge.s32.totalorder %s1277_s25, 2 }
 0x1cd   : > { %s1680_s0 = sld [smem:[#allocation24_spill]] }
 0x1d2   : > { %s628_s18 = sand.u32 1, %s1679_s10  }
 0x1d3   : > { %p1681_p4 = scmp.ne.s32.totalorder %s1680_s0, 0  ;;  %s629_s12 = scalar_lea.sflag [#allocation5], %s628_s18 }
 0x1d5   : > { %p925_p8 = pnand %p929_p2, %p1681_p4 }
 0x1d7   : > { %p926_p7 = pneg %p925_p8 }
 0x1d9   : > { %1232 = dma.done.wait (%p926_p7), %s629_s12, 64  }
 0x1da   : > { %1234 = vsyncadd (%p926_p7), %s629_s12, 4294967232  ;;  %s24_s25 = sadd.s32 1, %s1277_s25   ;;  %s1682_s26 = sld [smem:[#allocation21_spill]] }
 0x1db   : > { %p21_p6 = scmp.ge.s32.totalorder %s24_s25, 6   ;;  %s1683_s14 = sld [smem:[#allocation17_spill]] }
 0x1dc   : > { %s1684_s20 = sld [smem:[#allocation23_spill]]  ;;  %s1688_s15 = smov %s1241_s16 }
 0x1dd   : > { %s1685_s22 = sld [smem:[#allocation19_spill]]  ;;  %s1689_s16 = smov %s1245_s17 }
 0x1de   : > { %s1686_s28 = sld [smem:[#allocation20_spill]]  ;;  %s1691_s18 = smov %s1253_s19 }
 0x1df   : > { %s1687_s24 = sld [smem:[#allocation22_spill]]  ;;  %s1693_s21 = smov %s1269_s23 }
 0x1e0   : > { %s1690_s17 = smov %s1682_s26  ;;  %23 = sbr.rel (!%p21_p6) target bundleno = 17 (0x11), region = 119 }
 0x1e1   : > { %s1692_s19 = smov %s1683_s14 }
 0x1e4   : > { %s1694_s23 = smov %s1686_s28 }
 0x1e5   :  { %635 = vsyncpa [#allocation4], 1 }
 0x1e6   :  { %637 = vsyncpa [#allocation4 + $0x1], 1 }
 0x1e7   :  { %638 = vsyncpa [#allocation7], 1 }
 0x1e8   :  { %640 = vsyncpa [#allocation7 + $0x1], 1 }
 0x1e9   :  { %641 = vsyncpa [#allocation10], 1 }
 0x1ea   :  { %643 = vsyncpa [#allocation10 + $0x1], 1 }
 0x1eb   :  { %644 = vsyncpa [#allocation5], 1 }
 0x1ec   :  { %646 = vsyncpa [#allocation5 + $0x1], 1 }

// kernel: tpu_custom_call.1
= control target key start
LH: loop header
LB: loop body
LE: loop exit
PB: predicated region body
PF: predicated region fallthrough
CT: control target
= control target key end

     0   :  { %s1639_s0 = inlined_call_operand.hbm [shape: bf16[16,128], index: 0, kind: input, shape index: {}]   ;;  %s1640_s1 = inlined_call_operand.hbm [shape: bf16[128,256], index: 1, kind: input, shape index: {}]   ;;  %s1641_s2 = inlined_call_operand.hbm [shape: bf16[128,256], index: 2, kind: input, shape index: {}]   ;;  %s1642_s3 = inlined_call_operand.hbm [shape: bf16[256,128], index: 3, kind: input, shape index: {}]   ;;  %s1643_s4 = inlined_call_operand.hbm [shape: bf16[16,128], index: 4, kind: output, shape index: {}]  }
   0x1   :  { %1662 = sst [smem:[#allocation27_spill]] %s1639_s0 }
   0x2   :  { %1663 = sst [smem:[#allocation28_spill]] %s1640_s1 }
   0x3   :  { %1664 = sst [smem:[#allocation29_spill]] %s1641_s2 }
   0x4   :  { %1665 = sst [smem:[#allocation30_spill]] %s1643_s4 }
   0x5   :  { %9 = vsyncpa [#allocation4], 0 }
   0x6   :  { %11 = vsyncpa [#allocation4 + $0x1], 0 }
   0x7   :  { %12 = vsyncpa [#allocation7], 0 }
   0x8   :  { %14 = vsyncpa [#allocation7 + $0x1], 0 }
   0x9   :  { %15 = vsyncpa [#allocation10], 0 }
   0xa   :  { %17 = vsyncpa [#allocation10 + $0x1], 0 }
   0xb   :  { %18 = vsyncpa [#allocation5], 0 }
   0xc   :  { %20 = vsyncpa [#allocation5 + $0x1], 0  ;;  %s1334_s15 = smov 0   ;;  %s1336_s16 = smov 0  }
   0xd   :  { %s1338_s17 = smov 0   ;;  %s1340_s18 = smov 0  }
   0xe   :  { %s1342_s19 = smov 0   ;;  %s1344_s20 = smov 0  }
   0xf   :  { %s1346_s21 = smov 0   ;;  %s1348_s22 = smov 0  }
  0x10   :  { %s1350_s23 = smov 0   ;;  %s1352_s24 = smov 0  }
  0x11   :  { %s1354_s25 = smov 0  }
  0x12 LB: > { %1666 = sst [smem:[#allocation16_spill]] %s1275_s18  ;;  %p53_p0 = scmp.eq.s32.totalorder %s1303_s25, 0  ;;  %s1303_s25 = sphi %s1354_s25, %s26_s25   ;;  %s1299_s24 = sphi %s1352_s24, %s1703_s24   ;;  %s1295_s23 = sphi %s1350_s23, %s1710_s23   ;;  %s1291_s22 = sphi %s1348_s22, %s1701_s22   ;;  %s1287_s21 = sphi %s1346_s21, %s1709_s21   ;;  %s1283_s20 = sphi %s1344_s20, %s1700_s20   ;;  %s1279_s19 = sphi %s1342_s19, %s1708_s19   ;;  %s1275_s18 = sphi %s1340_s18, %s1707_s18   ;;  %s1271_s17 = sphi %s1338_s17, %s1706_s17   ;;  %s1267_s16 = sphi %s1336_s16, %s1705_s16   ;;  %s1263_s15 = sphi %s1334_s15, %s1704_s15  }
  0x13   : > { %1667 = sst [smem:[#allocation17_spill]] %s1283_s20  ;;  %s71_s26 = sadd.s32 1, %s1271_s17 }
  0x14   : > { %1668 = sst [smem:[#allocation18_spill]] %s1291_s22  ;;  %p78_p1 = scmp.ne.s32.totalorder %s1271_s17, %s1267_s16 }
  0x15   : > { %1669 = sst [smem:[#allocation19_spill]] %s1299_s24  ;;  %p1650_p2 = scmp.lt.s32.totalorder %s1303_s25, 4 }
  0x16   : > { %1670 = sst [smem:[#allocation20_spill]] %s1303_s25  ;;  %s205_s27 = sand.u32 1, %s1303_s25  }
  0x17   : > { %p80_p3 = por %p78_p1, %p53_p0  ;;  %s1644_s28 = sand.u32 1, %s1271_s17  }
  0x18   : > { %s788_s29 = sshll.u32 %s1295_s23, 2  ;;  %s1401_s30 = sshll.u32 %s1644_s28, 6 }
  0x19   : > { %s1671_s1 = sld [smem:[#allocation28_spill]]  ;;  %s209_s9 = scalar_lea.vmem [#allocation6], %s1401_s30 }
  0x1a   : > { %s216_s10 = sshll.u32 %s209_s9, 4  ;;  %p1409_p4 = pnand %p1650_p2, %p80_p3  ;;  %s217_s10 = int_to_ptr.vmem [resolvable:$true] %s216_s10 }
  0x1b   : > { %s1413_s12 = scalar_lea.sflag [#allocation7], %s205_s27  ;;  %s1645_s13 = smov 128  }
  0x1c   : > { %s1646_s14 = smov 64   ;;  %s1648_s5 = smov 4  }
  0x1d   : > { %s1673_s2 = sld [smem:[#allocation29_spill]]  ;;  %p794_p5 = scmp.ge.s32.totalorder %s1303_s25, 1 }
  0x1e   : > { %p267_p6 = scmp.lt.s32.totalorder %s1303_s25, 5  ;;  %s38_s6 = sadd.s32 1, %s1299_s24 }
  0x1f   : > { %s213_s7 = scalar_lea.hbm %s1671_s1, %s788_s29  ;;  %p52_p9 = scmp.ne.s32.totalorder %s1283_s20, %s1279_s19 }
  0x20   : > { %s214_s8 = sshll.u32 %s213_s7, 4  ;;  %p1428_p7 = pnand %p794_p5, %p267_p6  ;;  %s215_s8 = int_to_ptr.hbm [resolvable:$true] %s214_s8 }
  0x21   : > { %944 = dma.hbm_to_vmem [thread:$0]  (!%p1409_p4), %s215_s8, 1024, %s217_s10, %s1413_s12, %s1645_s13, %s1646_s14, %s1648_s5  }
  0x22   : > { %s1433_s8 = sadd.s32 4294967295, %s1303_s25   ;;  %s782_s10 = sadd.s32 4294967294, %s1303_s25  }
  0x23   : > { %s234_s27 = scalar_lea.hbm %s1673_s2, %s788_s29  ;;  %s35_s29 = sadd.s32 1, %s1295_s23 }
  0x24   : > { %s235_s9 = sshll.u32 %s234_s27, 4  ;;  %p36_p8 = scmp.ge.s32.totalorder %s35_s29, 2  ;;  %s1426_s9 = int_to_ptr.hbm [resolvable:$true] %s235_s9 }
  0x25   : > { %s45_s7 = sadd.s32 1, %s1283_s20  ;;  %p58_p10 = scmp.ne.s32.totalorder %s1279_s19, %s1275_s18 }
  0x26   : > { %s1712_s29 = smov (%p36_p8, %s35_s29), 0  ;;  %s1714_s6 = smov (!%p36_p8, %s38_s6), %s1299_s24 }
  0x27   : > { %1675 = sst [smem:[#allocation21_spill]] %s1712_s29  ;;  %p1451_p11 = por %p53_p0, %p52_p9 }
  0x28   : > { %p59_p12 = scmp.eq.s32.totalorder %s1433_s8, 0  ;;  %p40_p13 = scmp.ge.s32.totalorder %s1714_s6, 2 }
  0x29   : > { %s68_s13 = ssub.s32 %s1295_s23, %s1712_s29  ;;  %p84_p0 = scmp.ne.s32.totalorder %s1267_s16, %s1263_s15 }
  0x2a   : > { %p1461_p1 = por %p59_p12, %p58_p10  ;;  %p69_p3 = scmp.eq.s32.totalorder %s68_s13, 0 }
  0x2b   : > { %s1716_s6 = smov (%p40_p13, %s1714_s6), 0  ;;  %p160_p6 = scmp.eq.s32.totalorder %s1433_s8, 3 }
  0x2c   : > { %1678 = sst [smem:[#allocation22_spill]] %s1716_s6  ;;  %s42_s1 = ssub.s32 %s1299_s24, %s1716_s6 }
  0x2d   : > { %s1470_s5 = scalar_select %p69_p3, %s1271_s17, %s71_s26  }
  0x2e   : > { %p43_p5 = scmp.eq.s32.totalorder %s42_s1, 0  ;;  %p1477_p8 = por %p84_p0, %p59_p12 }
  0x2f   : > { %1679 = sst [smem:[#allocation23_spill]] %s1470_s5  ;;  %p166_p2 = scmp.eq.s32.totalorder %s782_s10, 3 }
  0x30   : > { %s1482_s29 = scalar_select %p43_p5, %s1283_s20, %s45_s7  }
  0x31   : > { %p1487_p13 = por %p160_p6, %p52_p9  ;;  %p1494_p3 = por %p166_p2, %p58_p10 }
  0x32   : > { %1681 = sst [smem:[#allocation24_spill]] %s1482_s29  ;;  %s186_s1 = sand.u32 1, %s1283_s20  }
  0x33   : > { %s1682_s13 = scalar_select %p1487_p13, 1, 0 }
  0x34   : > { %s1684_s15 = scalar_select %p1494_p3, 1, 0 }
  0x35   : > { %1683 = sst [smem:[#allocation25_spill]] %s1682_s13  ;;  %s786_s26 = sshll.u32 %s1299_s24, 2 }
  0x36   : > { %1685 = sst [smem:[#allocation26_spill]] %s1684_s15  ;;  %s785_s6 = sshll.u32 %s186_s1, 2 }
  0x37   : > { %s1686_s0 = sld [smem:[#allocation27_spill]]  ;;  %s190_s4 = scalar_lea.vmem [#allocation3], %s785_s6 }
  0x38   : > { %s198_s13 = sshll.u32 %s190_s4, 4  ;;  %p1687_p2 = scmp.lt.s32.totalorder %s1303_s25, 4  ;;  %s199_s13 = int_to_ptr.vmem [resolvable:$true] %s198_s13 }
  0x39   : > { %s230_s15 = scalar_lea.vmem [#allocation8], %s1401_s30  ;;  %s187_s24 = scalar_lea.sflag [#allocation4], %s186_s1 }
  0x3a   : > { %p939_p9 = pnand %p1687_p2, %p1451_p11  ;;  %s237_s20 = sshll.u32 %s230_s15, 4  ;;  %s238_s20 = int_to_ptr.vmem [resolvable:$true] %s237_s20 }
  0x3b   : > { %s1688_s18 = smov 4   ;;  %s1689_s10 = smov 64  }
  0x3c   : > { %s1690_s7 = smov 128   ;;  %s1691_s22 = sand.u32 1, %s1271_s17  }
  0x3d   : > { %s194_s29 = scalar_lea.hbm %s1686_s0, %s786_s26  ;;  %s251_s0 = scalar_lea.vmem [#allocation9], %s1401_s30 }
  0x3e   : > { %s196_s5 = sshll.u32 %s194_s29, 4  ;;  %s903_s29 = sshll.u32 %s1295_s23, 6  ;;  %s197_s5 = int_to_ptr.hbm [resolvable:$true] %s196_s5 }
  0x3f   : > { %941 = dma.hbm_to_vmem [thread:$0]  (!%p939_p9), %s197_s5, 64, %s199_s13, %s187_s24  }
  0x40   : > { %947 = dma.hbm_to_vmem [thread:$0]  (!%p1409_p4), %s1426_s9, 1024, %s238_s20, %s1413_s12, %s1690_s7, %s1689_s10, %s1688_s18  }
  0x41   : > { %s256_s26 = scalar_lea.hbm %s1642_s3, %s903_s29  ;;  %s259_s27 = sshll.u32 %s251_s0, 4  ;;  %s260_s27 = int_to_ptr.vmem [resolvable:$true] %s259_s27 }
  0x42   : > { %s257_s25 = sshll.u32 %s256_s26, 4  ;;  %s248_s15 = scalar_lea.sflag [#allocation10], %s1691_s22  ;;  %s258_s25 = int_to_ptr.hbm [resolvable:$true] %s257_s25 }
  0x43   : > { %950 = dma.hbm_to_vmem [thread:$0]  (!%p1409_p4), %s258_s25, 1024, %s260_s27, %s248_s15, %s1689_s10, %s1689_s10, %s1688_s18  }
  0x44   : > { %271 = sbr.rel (%p1428_p7) target bundleno = 448 (0x1c0), region = 36  ;;  %s1530_s20 = sand.u32 (!%p1428_p7), 1, %s1279_s19  }
  0x45   : > { %s795_s0 = sshll.u32 (!%p1428_p7), %s1530_s20, 2  ;;  %s274_s24 = scalar_lea.sflag (!%p1428_p7), [#allocation4], %s1530_s20 }
  0x46   : > { %s1534_s30 = scalar_lea.vmem (!%p1428_p7), [#allocation3], %s795_s0 }
  0x49   : > { %1246 = dma.done.wait (%p1461_p1), %s274_s24, 64  }
  0x4a   : > { %1248 = vsyncadd (%p1461_p1), %s274_s24, 4294967232  ;;  %s283_s18 = sand.u32 1, %s1433_s8   ;;  %s285_s22 = sand.u32 1, %s1267_s16  }
  0x4b   : > { %s796_s25 = sshll.u32 %s285_s22, 6  ;;  %s284_s28 = scalar_lea.sflag [#allocation7], %s283_s18 }
  0x4c   : > { %s1542_s11 = scalar_lea.vmem [#allocation6], %s796_s25 }
  0x4d   : > { %1250 = dma.done.wait (%p1477_p8), %s284_s28, 2048  }
  0x4e   : > { %1252 = vsyncadd (%p1477_p8), %s284_s28, 4294965248  ;;  %s1548_s12 = scalar_lea.vmem [#allocation8], %s796_s25  ;;  %s304_s5 = scalar_lea.sflag [#allocation10], %s285_s22 }
  0x4f   : > { %s1550_s14 = scalar_lea.vmem [#allocation9], %s796_s25 }
  0x50   : > { %1254 = dma.done.wait (%p1477_p8), %s304_s5, 1024  }
  0x51   : > { %1256 = vsyncadd (%p1477_p8), %s304_s5, 4294966272  ;;  %s1556_s9 = scalar_lea.vmem [#allocation11], %s795_s0  ;;  %p800_p4 = scmp.ne.s32.totalorder %s1287_s21, 0 }
  0x53   : > { %352 = sbr.rel (%p800_p4) target bundleno = 90 (0x5a), region = 56 }
  0x58   : > { %v1308_v0 = vmov 0.0  }
  0x59   : > { %353 = vst [vmem:[#allocation2] sm:$0xff] %v1308_v0 }
  0x5a PF: > { %v911_v1 = vld [vmem:[%s1542_s11 + $0x38] sm:$0xff]  ;;  %v910_v2 = vld [vmem:[%s1542_s11 + $0x30] sm:$0xff]  ;;  %v909_v5 = vld [vmem:[%s1542_s11 + $0x28] sm:$0xff]  ;;  %p898_p7 = scmp.ne.s32.totalorder %s1287_s21, 1 }
  0x5b   : > { %419 = vmatpush.bf16.msra.mxu0 %v911_v1  ;;  %v919_v3 = vld [vmem:[%s1548_s12 + $0x38] sm:$0xff]  ;;  %v918_v4 = vld [vmem:[%s1548_s12 + $0x30] sm:$0xff]  ;;  %v917_v6 = vld [vmem:[%s1548_s12 + $0x28] sm:$0xff] }
  0x5c   : > { %496 = vmatpush.bf16.msra.mxu1 %v919_v3  ;;  %v908_v7 = vld [vmem:[%s1542_s11 + $0x20] sm:$0xff]  ;;  %v907_v9 = vld [vmem:[%s1542_s11 + $0x18] sm:$0xff]  ;;  %v906_v11 = vld [vmem:[%s1542_s11 + $0x10] sm:$0xff] }
  0x5d   : > { %v916_v8 = vld [vmem:[%s1548_s12 + $0x20] sm:$0xff]  ;;  %v915_v10 = vld [vmem:[%s1548_s12 + $0x18] sm:$0xff]  ;;  %v914_v12 = vld [vmem:[%s1548_s12 + $0x10] sm:$0xff] }
  0x5e   : > { %v905_v13 = vld [vmem:[%s1542_s11 + $0x8] sm:$0xff]  ;;  %v904_v15 = vld [vmem:[%s1542_s11] sm:$0xff]  ;;  %v354_v17 = vld [vmem:[%s1534_s30] sm:$0xf] }
  0x5f   : > { %420 = vmatpush.bf16.msra.mxu0 %v910_v2  ;;  %v913_v14 = vld [vmem:[%s1548_s12 + $0x8] sm:$0xff]  ;;  %v912_v16 = vld [vmem:[%s1548_s12] sm:$0xff]  ;;  %v927_v18 = vld [vmem:[%s1550_s14 + $0x38] sm:$0xff] }
  0x60   : > { %497 = vmatpush.bf16.msra.mxu1 %v918_v4  ;;  %596 = vmatpush.bf16.msra.mxu2 %v927_v18  ;;  %v926_v19 = vld [vmem:[%s1550_s14 + $0x30] sm:$0xff]  ;;  %v925_v20 = vld [vmem:[%s1550_s14 + $0x28] sm:$0xff]  ;;  %v924_v21 = vld [vmem:[%s1550_s14 + $0x20] sm:$0xff] }
  0x61   : > { %v923_v22 = vld [vmem:[%s1550_s14 + $0x18] sm:$0xff]  ;;  %v922_v23 = vld [vmem:[%s1550_s14 + $0x10] sm:$0xff]  ;;  %v921_v24 = vld [vmem:[%s1550_s14 + $0x8] sm:$0xff] }
  0x62   : > { %v920_v25 = vld [vmem:[%s1550_s14] sm:$0xff]  ;;  %v531_v46 = vld [vmem:[#allocation2] sm:$0xff] }
  0x63   : > { %421 = vmatpush.bf16.msra.mxu0 %v909_v5 }
  0x64   : > { %498 = vmatpush.bf16.msra.mxu1 %v917_v6  ;;  %597 = vmatpush.bf16.msra.mxu2 %v926_v19 }
  0x67   : > { %422 = vmatpush.bf16.msra.mxu0 %v908_v7 }
  0x68   : > { %499 = vmatpush.bf16.msra.mxu1 %v916_v8  ;;  %598 = vmatpush.bf16.msra.mxu2 %v925_v20 }
  0x6b   : > { %423 = vmatpush.bf16.msra.mxu0 %v907_v9 }
  0x6c   : > { %500 = vmatpush.bf16.msra.mxu1 %v915_v10  ;;  %599 = vmatpush.bf16.msra.mxu2 %v924_v21 }
  0x6f   : > { %424 = vmatpush.bf16.msra.mxu0 %v906_v11 }
  0x70   : > { %501 = vmatpush.bf16.msra.mxu1 %v914_v12  ;;  %600 = vmatpush.bf16.msra.mxu2 %v923_v22 }
  0x73   : > { %425 = vmatpush.bf16.msra.mxu0 %v905_v13 }
  0x74   : > { %502 = vmatpush.bf16.msra.mxu1 %v913_v14  ;;  %601 = vmatpush.bf16.msra.mxu2 %v922_v23 }
  0x77   : > { %426 = vmatpush.bf16.msra.mxu0 %v904_v15 }
  0x78   : > { %503 = vmatpush.bf16.msra.mxu1 %v912_v16  ;;  %602 = vmatpush.bf16.msra.mxu2 %v921_v24 }
  0x7a   : > { %427 = vmatmul.bf16.vlgmr.msra.gmra.mxu0 %v354_v17 }
  0x7b   : > { %504 = vmatmul.bf16.vlgmr.msra.gmra.mxu1 %v354_v17 }
  0x7c   : > { %603 = vmatpush.bf16.msra.mxu2 %v920_v25 }
  0xf7   : > { %v428_v26 = vpop.f32.mrf.mxu0 }
  0xf8   : > { %v865_v27 = vmul.f32 -1.442695, %v428_v26  ;;  %v505_v28 = vpop.f32.mrf.mxu1 }
  0xfa   : > { %1049 = vpow2.f32 %v865_v27 }
  0xff   : > { %v430_v29 = vpop.f32.mrf.mxu0 }
 0x100   : > { %v1050_v30 = vpop.eup %1049  ;;  %v507_v32 = vpop.f32.mrf.mxu1 }
 0x101   : > { %v512_v31 = vadd.f32 1.0, %v1050_v30 }
 0x103   : > { %1051 = vrcp.f32 %v512_v31  ;;  %v524_v36 = vand.u32 2147483648, %v512_v31  ;;  %v522_v38 = vand.u32 2147483647, %v512_v31  ;;  %vm518_vm1 = vweird.f32 %v512_v31 }
 0x105   : > { %v525_v40 = vor.u32 1.1754944e-38, %v524_v36  ;;  %vm523_vm3 = vcmp.eq.f32.partialorder %v522_v38, 8.507059e+37 }
 0x109   : > { %v1052_v33 = vpop.eup %1051 }
 0x10a   : > { %v514_v34 = vmul.f32 %v1052_v33, %v512_v31  ;;  %vm519_vm0 = vweird.f32 %v1052_v33 }
 0x10b   : > { %vm520_vm2 = vmor %vm518_vm1, %vm519_vm0 }
 0x10c   : > { %v515_v35 = vsub.f32 1.0, %v514_v34 }
 0x10e   : > { %v516_v37 = vmul.f32 %v1052_v33, %v515_v35 }
 0x110   : > { %v517_v39 = vadd.f32 %v1052_v33, %v516_v37 }
 0x112   : > { %v521_v41 = vsel %vm520_vm2, %v1052_v33, %v517_v39 }
 0x113   : > { %v526_v42 = vsel %vm523_vm3, %v525_v40, %v521_v41 }
 0x114   : > { %v528_v43 = vmul.f32 %v526_v42, %v428_v26 }
 0x116   : > { %v529_v44 = vmul.f32 %v528_v43, %v505_v28 }
 0x118   : > { %v530_v45 = vpack.c.bf16 %v529_v44, %v529_v44 }
 0x11a   : > { %604 = vmatmul.bf16.vlgmr.msra.gmra.mxu2 %v530_v45 }
 0x19d   : > { %v605_v47 = vpop.f32.mrf.mxu2 }
 0x19e   : > { %v609_v48 = vadd.f32 %v605_v47, %v531_v46 }
 0x1a0   : > { %610 = vst [vmem:[#allocation2] sm:$0xff] %v609_v48 }
 0x1a1   : > { %614 = sbr.rel (%p898_p7) target bundleno = 427 (0x1ab), region = 60 }
 0x1a5   : > { %v607_v49 = vpop.f32.mrf.mxu2 }
 0x1a7   : > { %v615_v50 = vld [vmem:[#allocation2] sm:$0xff] }
 0x1a8   : > { %v616_v51 = vpack.c.bf16 %v615_v50, %v615_v50 }
 0x1aa   : > { %617 = vst [vmem:[%s1556_s9] sm:$0xf] %v616_v51 }
 0x1ab PF: > { %s1692_s2 = sld [smem:[#allocation18_spill]]  ;;  %s631_s6 = sshll.u32 %s1556_s9, 4  ;;  %s632_s6 = int_to_ptr.vmem [resolvable:$true] %s631_s6 }
 0x1ac   : > { %s1694_s7 = sld [smem:[#allocation30_spill]]  ;;  %s619_s21 = scalar_lea.sflag [#allocation5], %s1530_s20 }
 0x1b1   : > { %s900_s13 = sshll.u32 %s1692_s2, 2 }
 0x1b2   : > { %s629_s29 = scalar_lea.hbm %s1694_s7, %s900_s13  ;;  %s1193_s24 = scalar_lea.hbm %s1694_s7, 8 }
 0x1b3   : > { %s633_s4 = sshll.u32 %s629_s29, 4  ;;  %s634_s4 = int_to_ptr.hbm [resolvable:$true] %s633_s4 }
 0x1b4   : > { %s1187_s26 = sshra.s32 %s634_s4, 4  ;;  %s1188_s26 = int_to_ptr.hbm [resolvable:$true] %s1187_s26 }
 0x1b5   : > { %s1189_s27 = scalar_lea.hbm %s1188_s26, 4  ;;  %p1194_p1 = scmp.lt.s32.totalorder %s1188_s26, %s1694_s7 }
 0x1b6   : > { %p1190_p10 = scmp.ne.s32.totalorder %s1188_s26, %s1189_s27  ;;  %p1195_p0 = scmp.lt.s32.totalorder %s1193_s24, %s1189_s27 }
 0x1b8   : > { %p1191_p11 = pnand %p1190_p10, %p1487_p13  ;;  %p1196_p5 = por %p1195_p0, %p1194_p1 }
 0x1ba   : > { %p1192_p12 = pneg %p1191_p11 }
 0x1bc   : > { %p1197_p6 = pnand %p1196_p5, %p1192_p12 }
 0x1be   : > { %1200 = shalt.err (!%p1197_p6)
}
 0x1bf   : > { %936 = dma.vmem_to_hbm [thread:$0]  (%p1487_p13), %s632_s6, 64, %s634_s4, %s619_s21  }
 0x1c0 PF: > { %s1695_s20 = sld [smem:[#allocation20_spill]] }
 0x1c1   : > { %s1696_s22 = sld [smem:[#allocation16_spill]] }
 0x1c6   : > { %p956_p8 = scmp.ge.s32.totalorder %s1695_s20, 2 }
 0x1c7   : > { %s645_s28 = sand.u32 1, %s1696_s22  }
 0x1c8   : > { %p952_p2 = pnand %p956_p8, %p1494_p3  ;;  %s646_s11 = scalar_lea.sflag [#allocation5], %s645_s28 }
 0x1ca   : > { %p953_p9 = pneg %p952_p2 }
 0x1cc   : > { %1258 = dma.done.wait (%p953_p9), %s646_s11, 64  }
 0x1cd   : > { %1260 = vsyncadd (%p953_p9), %s646_s11, 4294967232  ;;  %s26_s25 = sadd.s32 1, %s1695_s20   ;;  %s1698_s12 = sld [smem:[#allocation23_spill]] }
 0x1ce   : > { %p23_p4 = scmp.ge.s32.totalorder %s26_s25, 6   ;;  %s1699_s5 = sld [smem:[#allocation17_spill]] }
 0x1cf   : > { %s1700_s20 = sld [smem:[#allocation24_spill]]  ;;  %s1704_s15 = smov %s1267_s16 }
 0x1d0   : > { %s1701_s22 = sld [smem:[#allocation19_spill]]  ;;  %s1705_s16 = smov %s1271_s17 }
 0x1d1   : > { %s1702_s14 = sld [smem:[#allocation21_spill]]  ;;  %s1707_s18 = smov %s1279_s19 }
 0x1d2   : > { %s1703_s24 = sld [smem:[#allocation22_spill]]  ;;  %s1709_s21 = smov %s1295_s23 }
 0x1d3   : > { %s1706_s17 = smov %s1698_s12  ;;  %25 = sbr.rel (!%p23_p4) target bundleno = 18 (0x12), region = 126 }
 0x1d4   : > { %s1708_s19 = smov %s1699_s5 }
 0x1d7   : > { %s1710_s23 = smov %s1702_s14 }
 0x1d8   :  { %652 = vsyncpa [#allocation4], 1 }
 0x1d9   :  { %654 = vsyncpa [#allocation4 + $0x1], 1 }
 0x1da   :  { %655 = vsyncpa [#allocation7], 1 }
 0x1db   :  { %657 = vsyncpa [#allocation7 + $0x1], 1 }
 0x1dc   :  { %658 = vsyncpa [#allocation10], 1 }
 0x1dd   :  { %660 = vsyncpa [#allocation10 + $0x1], 1 }
 0x1de   :  { %661 = vsyncpa [#allocation5], 1 }
 0x1df   :  { %663 = vsyncpa [#allocation5 + $0x1], 1 }

</bundles_post_ra>
